<compile_context>
chip_gen: v6e
topology: v6e:2x2x1
jax: 0.10.0
libtpu: 0.0.40
codegen_flags: <defaults>
</compile_context>

<pallas_src>
import jax
import jax.numpy as jnp
from jax.experimental import pallas as pl
from jax.experimental.pallas import tpu as pltpu


def _round_up(x, m):
    return ((x + m - 1) // m) * m


def _make_dual_kernel(n_layers, batch, tm, need_mask):
    """Kernel for an n_layers-deep MLP (n_layers >= 2).

    Layer 0: split-input matmuls (implicit concat) + bias + ReLU.
    Layers 1..n-2: matmul + bias + ReLU on the MXU (f32 accumulation).
    Layer n-1: (hid -> 1) as multiply + lane-reduce, then exp, (tm,1) store.
    """
    assert n_layers >= 2

    def kernel(s_ref, a_ref, *rest):
        out_ref = rest[-1]
        p = rest[:-1]

        # ---- first layer: implicit concat([state, action], dim=1) ----
        w0s = p[0][...]          # (state_dim, hid_p0)   input_dtype
        w0a = p[1][...]          # (action_dim, hid_p0)  input_dtype
        b0 = p[2][...]           # (1, hid_p0)           f32
        h = jnp.dot(s_ref[...], w0s, preferred_element_type=jnp.float32)
        h = h + jnp.dot(a_ref[...], w0a, preferred_element_type=jnp.float32)
        h = jnp.maximum(h + b0, 0.0)                     # nn.ReLU, f32

        # ---- middle hidden layers (MXU at weight dtype, f32 accumulate) ----
        idx = 3
        for _ in range(n_layers - 2):
            w = p[idx][...]
            b = p[idx + 1][...]
            idx += 2
            h = jnp.maximum(
                jnp.dot(h.astype(w.dtype), w,
                        preferred_element_type=jnp.float32) + b, 0.0)

        # ---- final layer: lane reduce instead of a 1-column matmul ----
        w_last = p[idx][...]         # (1, hid_p_last), f32, zero-padded
        b_last = p[idx + 1][...]     # (1, 1), f32
        g = jnp.sum(h * w_last, axis=-1, keepdims=True) + b_last  # (tm, 1)
        g = jnp.exp(g)                                   # ExpActivation (EUP)

        if need_mask:
            # Zero rows beyond the true batch so padded rows (exp of a ReLU
            # chain of biases) never leak +inf into the raw kernel output.
            row = (pl.program_id(0) * tm
                   + jax.lax.broadcasted_iota(jnp.int32, (tm, 1), 0))
            g = jnp.where(row < batch, g, 0.0)

        out_ref[...] = g.astype(out_ref.dtype)           # 4 B/row writeback

    return kernel


def dual_forward(state, action, params, *, tm_max=1024, single_tile_max=512,
                 input_dtype=jnp.bfloat16):
    """params: list of (W, b) with W shape (in, out), b shape (1, out).

    Layer structure: [state_dim+action_dim] -> hidden... -> [1].
    `input_dtype` is the dtype fed to the MXU (state/action/weight matrices);
    accumulation, biases, activations and the output stay float32.
    """
    batch, state_dim = state.shape
    action_dim = action.shape[1]
    n_layers = len(params)
    assert n_layers >= 2, "dual_forward expects at least one hidden layer"
    assert params[0][0].shape[0] == state_dim + action_dim, (
        "params[0] weight rows must be ordered [state; action] to match "
        "torch.cat([state, action], dim=1)")
    assert tm_max % 8 == 0 and single_tile_max % 8 == 0

    f32 = jnp.float32

    # ---- parameter preprocessing (once, outside the kernel hot path) ----
    # Pad hidden widths to multiples of 128 lanes, split W0 for the implicit
    # concat, cast MXU operands to input_dtype, and turn the last (hid, 1)
    # weight into a (1, hid_p) f32 row for the VPU/XLU final layer.
    hid_dims = [w.shape[1] for (w, _) in params[:-1]]
    hid_p = [_round_up(h, 128) for h in hid_dims]

    flat = []
    w0, b0 = params[0]
    h0p = hid_p[0]
    w0p = (jnp.zeros((w0.shape[0], h0p), input_dtype)
           .at[:, : w0.shape[1]].set(w0.astype(input_dtype)))
    flat.append(w0p[:state_dim])                          # (state_dim, hid_p0)
    flat.append(w0p[state_dim:state_dim + action_dim])    # (action_dim, hid_p0)
    flat.append(jnp.zeros((1, h0p), f32).at[:, : b0.shape[1]]
                .set(b0.astype(f32)))

    for li in range(1, n_layers - 1):
        w, b = params[li]
        rin, cout = w.shape
        rp, cp = hid_p[li - 1], hid_p[li]
        flat.append(jnp.zeros((rp, cp), input_dtype)
                    .at[:rin, :cout].set(w.astype(input_dtype)))
        flat.append(jnp.zeros((1, cp), f32).at[:, :cout].set(b.astype(f32)))

    w_last, b_last = params[-1]                           # (hid, 1), (1, 1)
    rp = hid_p[-1]
    w_last_row = (jnp.zeros((1, rp), f32)
                  .at[:, : w_last.shape[0]]
                  .set(w_last[:, 0].astype(f32)[None, :]))
    flat.append(w_last_row)
    flat.append(b_last.reshape(1, 1).astype(f32))

    # ---- batch tiling: sublane-aligned rows, 1-D "parallel" grid ----
    batch8 = _round_up(batch, 8)
    if batch8 <= single_tile_max:
        tm = batch8                                       # one tile is enough
    else:
        # >= 2 grid steps so both v7x TensorCores get work; tiles <= tm_max.
        tm = min(tm_max, _round_up((batch8 + 1) // 2, 8))
    batch_p = _round_up(batch, tm)

    state = state.astype(input_dtype)
    action = action.astype(input_dtype)
    if batch_p != batch:
        pad = batch_p - batch
        state = jnp.pad(state, ((0, pad), (0, 0)))
        action = jnp.pad(action, ((0, pad), (0, 0)))
    grid = (batch_p // tm,)

    vm = pltpu.MemorySpace.VMEM
    in_specs = [
        pl.BlockSpec((tm, state_dim), lambda i: (i, 0), memory_space=vm),
        pl.BlockSpec((tm, action_dim), lambda i: (i, 0), memory_space=vm),
    ]
    for arr in flat:
        # Constant index_map -> parameters stay VMEM-resident across the grid.
        in_specs.append(pl.BlockSpec(arr.shape, lambda i: (0, 0),
                                     memory_space=vm))
    # Narrow output: (tm, 1) block, ~4 B/row of HBM writeback.
    out_spec = pl.BlockSpec((tm, 1), lambda i: (i, 0), memory_space=vm)

    # ---- advisory cost estimate for XLA's scheduler ----
    flops = 2 * batch_p * (state_dim + action_dim) * hid_p[0]
    for li in range(1, n_layers - 1):
        flops += 2 * batch_p * hid_p[li - 1] * hid_p[li]
    flops += 2 * batch_p * hid_p[-1]                      # final reduce
    bytes_accessed = (state.size * state.dtype.itemsize
                      + action.size * action.dtype.itemsize
                      + batch_p * 4                       # (batch_p, 1) f32 out
                      + sum(int(a.size) * a.dtype.itemsize for a in flat))
    cost = pl.CostEstimate(flops=int(flops),
                           transcendentals=int(batch_p),
                           bytes_accessed=int(bytes_accessed))

    kernel = _make_dual_kernel(n_layers, batch, tm, need_mask=(batch_p != batch))
    out_padded = pl.pallas_call(
        kernel,
        out_shape=jax.ShapeDtypeStruct((batch_p, 1), jnp.float32),
        grid=grid,
        in_specs=in_specs,
        out_specs=out_spec,
        compiler_params=pltpu.CompilerParams(
            dimension_semantics=("parallel",)),
        cost_estimate=cost,
    )(state, action, *flat)

    return out_padded[:batch]


def init_dual_params(key, state_dim, action_dim, hid_shape, hid_layers):
    """Deterministic init matching the layer structure of `dual.__init__`.

    layers = [state_dim + action_dim] + hid_shape * hid_layers + [1]
    Weights are created as (in, out) (transposed vs torch.nn.Linear storage)
    with U(-1/sqrt(in), 1/sqrt(in)) like PyTorch's default init.
    """
    layers = [state_dim + action_dim] + list(hid_shape) * hid_layers + [1]
    params = []
    for i in range(len(layers) - 1):
        fan_in, fan_out = layers[i], layers[i + 1]
        key, kw, kb = jax.random.split(key, 3)
        bound = 1.0 / (fan_in ** 0.5)
        w = jax.random.uniform(kw, (fan_in, fan_out), jnp.float32, -bound, bound)
        b = jax.random.uniform(kb, (1, fan_out), jnp.float32, -bound, bound)
        params.append((w, b))
    return params


if __name__ == "__main__":
    # Small shapes consistent with the module's forward.
    batch = 2
    state_dim = 4
    action_dim = 4
    hid_shape = [32]
    hid_layers = 2

    key = jax.random.PRNGKey(0)
    key, ks, ka, kp = jax.random.split(key, 4)

    state = jax.random.normal(ks, (batch, state_dim), dtype=jnp.float32)
    action = jax.random.normal(ka, (batch, action_dim), dtype=jnp.float32)
    params = init_dual_params(kp, state_dim, action_dim, hid_shape, hid_layers)

    # Pure-JAX reference (same math, no Pallas, no padding, f32 throughout).
    sa = jnp.concatenate([state, action], axis=1)
    h = sa
    for i, (w, b) in enumerate(params):
        h = h @ w + b
        h = jnp.maximum(h, 0.0) if i < len(params) - 1 else jnp.exp(h)
    ref = h

    # Exact-f32 path: tight tolerance against the reference.
    out_f32 = dual_forward(state, action, params, input_dtype=jnp.float32)
    jax.block_until_ready(out_f32)
    assert out_f32.shape == (batch, 1)
    assert jnp.allclose(out_f32, ref, rtol=1e-5, atol=1e-5)

    # Default perf path (bf16 MXU operands, f32 accumulation): loose tolerance.
    out_bf16 = dual_forward(state, action, params)
    jax.block_until_ready(out_bf16)
    assert out_bf16.shape == (batch, 1)
    assert jnp.allclose(out_bf16, ref, rtol=5e-2, atol=5e-2)

    print("KERNEL_OK")
</pallas_src>

<mosaic_0001>
module attributes {stable_mosaic.version = 11 : i64} {
  func.func @kernel(%arg0: i32, %arg1: memref<8x4xf32, #tpu.memory_space<vmem>>, %arg2: memref<8x4xf32, #tpu.memory_space<vmem>>, %arg3: memref<4x128xf32, #tpu.memory_space<vmem>>, %arg4: memref<4x128xf32, #tpu.memory_space<vmem>>, %arg5: memref<1x128xf32, #tpu.memory_space<vmem>>, %arg6: memref<128x128xf32, #tpu.memory_space<vmem>>, %arg7: memref<1x128xf32, #tpu.memory_space<vmem>>, %arg8: memref<1x128xf32, #tpu.memory_space<vmem>>, %arg9: memref<1x1xf32, #tpu.memory_space<vmem>>, %arg10: memref<8x1xf32, #tpu.memory_space<vmem>>) attributes {dimension_semantics = [#tpu.dimension_semantics<parallel>], iteration_bounds = array<i64: 1>, scalar_prefetch = 0 : i64, scratch_operands = 0 : i64, tpu.core_type = #tpu.core_type<tc>, window_params = [{transform_indices = @transform_0, window_bounds = array<i64: 8, 4>}, {transform_indices = @transform_1, window_bounds = array<i64: 8, 4>}, {pipeline_mode = #tpu.pipeline_mode<synchronous>, transform_indices = @transform_2, window_bounds = array<i64: 4, 128>}, {pipeline_mode = #tpu.pipeline_mode<synchronous>, transform_indices = @transform_3, window_bounds = array<i64: 4, 128>}, {pipeline_mode = #tpu.pipeline_mode<synchronous>, transform_indices = @transform_4, window_bounds = array<i64: 1, 128>}, {pipeline_mode = #tpu.pipeline_mode<synchronous>, transform_indices = @transform_5, window_bounds = array<i64: 128, 128>}, {pipeline_mode = #tpu.pipeline_mode<synchronous>, transform_indices = @transform_6, window_bounds = array<i64: 1, 128>}, {pipeline_mode = #tpu.pipeline_mode<synchronous>, transform_indices = @transform_7, window_bounds = array<i64: 1, 128>}, {pipeline_mode = #tpu.pipeline_mode<synchronous>, transform_indices = @transform_8, window_bounds = array<i64: 1, 1>}, {transform_indices = @transform_9, window_bounds = array<i64: 8, 1>}]} {
    %c0 = arith.constant 0 : index
    %c0_0 = arith.constant 0 : index
    %0 = vector.load %arg3[%c0, %c0_0] : memref<4x128xf32, #tpu.memory_space<vmem>>, vector<4x128xf32>
    %c0_1 = arith.constant 0 : index
    %c0_2 = arith.constant 0 : index
    %1 = vector.load %arg4[%c0_1, %c0_2] : memref<4x128xf32, #tpu.memory_space<vmem>>, vector<4x128xf32>
    %c0_3 = arith.constant 0 : index
    %c0_4 = arith.constant 0 : index
    %2 = vector.load %arg5[%c0_3, %c0_4] : memref<1x128xf32, #tpu.memory_space<vmem>>, vector<1x128xf32>
    %c0_5 = arith.constant 0 : index
    %c0_6 = arith.constant 0 : index
    %3 = vector.load %arg1[%c0_5, %c0_6] : memref<8x4xf32, #tpu.memory_space<vmem>>, vector<8x4xf32>
    %cst = arith.constant dense<0.000000e+00> : vector<8x128xf32>
    %4 = tpu.matmul %3, %0, %cst {dimension_numbers = #tpu.dot_dimension_numbers<[1], [0], [0], [1], [0, 0, 1, 1], [], []>} : vector<8x4xf32>, vector<4x128xf32>, vector<8x128xf32> -> vector<8x128xf32>
    %c0_7 = arith.constant 0 : index
    %c0_8 = arith.constant 0 : index
    %5 = vector.load %arg2[%c0_7, %c0_8] : memref<8x4xf32, #tpu.memory_space<vmem>>, vector<8x4xf32>
    %cst_9 = arith.constant dense<0.000000e+00> : vector<8x128xf32>
    %6 = tpu.matmul %5, %1, %cst_9 {dimension_numbers = #tpu.dot_dimension_numbers<[1], [0], [0], [1], [0, 0, 1, 1], [], []>} : vector<8x4xf32>, vector<4x128xf32>, vector<8x128xf32> -> vector<8x128xf32>
    %7 = arith.addf %4, %6 : vector<8x128xf32>
    %8 = vector.broadcast %2 : vector<1x128xf32> to vector<8x128xf32>
    %9 = arith.addf %7, %8 : vector<8x128xf32>
    %cst_10 = arith.constant 0.000000e+00 : f32
    %10 = vector.broadcast %cst_10 : f32 to vector<8x128xf32>
    %11 = arith.maximumf %9, %10 : vector<8x128xf32>
    %c0_11 = arith.constant 0 : index
    %c0_12 = arith.constant 0 : index
    %12 = vector.load %arg6[%c0_11, %c0_12] : memref<128x128xf32, #tpu.memory_space<vmem>>, vector<128x128xf32>
    %c0_13 = arith.constant 0 : index
    %c0_14 = arith.constant 0 : index
    %13 = vector.load %arg7[%c0_13, %c0_14] : memref<1x128xf32, #tpu.memory_space<vmem>>, vector<1x128xf32>
    %cst_15 = arith.constant dense<0.000000e+00> : vector<8x128xf32>
    %14 = tpu.matmul %11, %12, %cst_15 {dimension_numbers = #tpu.dot_dimension_numbers<[1], [0], [0], [1], [0, 0, 1, 1], [], []>} : vector<8x128xf32>, vector<128x128xf32>, vector<8x128xf32> -> vector<8x128xf32>
    %15 = vector.broadcast %13 : vector<1x128xf32> to vector<8x128xf32>
    %16 = arith.addf %14, %15 : vector<8x128xf32>
    %cst_16 = arith.constant 0.000000e+00 : f32
    %17 = vector.broadcast %cst_16 : f32 to vector<8x128xf32>
    %18 = arith.maximumf %16, %17 : vector<8x128xf32>
    %c0_17 = arith.constant 0 : index
    %c0_18 = arith.constant 0 : index
    %19 = vector.load %arg8[%c0_17, %c0_18] : memref<1x128xf32, #tpu.memory_space<vmem>>, vector<1x128xf32>
    %c0_19 = arith.constant 0 : index
    %c0_20 = arith.constant 0 : index
    %20 = vector.load %arg9[%c0_19, %c0_20] : memref<1x1xf32, #tpu.memory_space<vmem>>, vector<1x1xf32>
    %21 = vector.broadcast %19 : vector<1x128xf32> to vector<8x128xf32>
    %22 = arith.mulf %18, %21 : vector<8x128xf32>
    %cst_21 = arith.constant dense<0.000000e+00> : vector<8xf32>
    %23 = vector.multi_reduction <add>, %22, %cst_21 [1] : vector<8x128xf32> to vector<8xf32>
    %24 = vector.shape_cast %23 : vector<8xf32> to vector<8x1xf32>
    %25 = vector.broadcast %20 : vector<1x1xf32> to vector<8x1xf32>
    %26 = arith.addf %24, %25 : vector<8x1xf32>
    %27 = math.exp %26 : vector<8x1xf32>
    %c8_i32 = arith.constant 8 : i32
    %28 = arith.muli %arg0, %c8_i32 : i32
    %29 = tpu.iota {dimensions = array<i32: 0>} : vector<8x1xi32>
    %30 = vector.broadcast %28 : i32 to vector<8x1xi32>
    %31 = arith.addi %30, %29 : vector<8x1xi32>
    %c2_i32 = arith.constant 2 : i32
    %32 = vector.broadcast %c2_i32 : i32 to vector<8x1xi32>
    %33 = arith.cmpi slt, %31, %32 : vector<8x1xi32>
    %cst_22 = arith.constant 0.000000e+00 : f32
    %34 = vector.broadcast %cst_22 : f32 to vector<8x1xf32>
    %35 = arith.select %33, %27, %34 : vector<8x1xi1>, vector<8x1xf32>
    %c0_23 = arith.constant 0 : index
    %c0_24 = arith.constant 0 : index
    %36 = vector.load %arg10[%c0_23, %c0_24] : memref<8x1xf32, #tpu.memory_space<vmem>>, vector<8x1xf32>
    tpu.vector_store %arg10[%c0_23, %c0_24], %35 {strides = array<i32>} : memref<8x1xf32, #tpu.memory_space<vmem>>, vector<8x1xf32>,
    return
  }
  func.func @transform_0(%arg0: i32) -> (i32, i32) {
    %c0_i32 = arith.constant 0 : i32
    %c0_i32_0 = arith.constant 0 : i32
    return %arg0, %c0_i32 : i32, i32
  }
  func.func @transform_1(%arg0: i32) -> (i32, i32) {
    %c0_i32 = arith.constant 0 : i32
    %c0_i32_0 = arith.constant 0 : i32
    return %arg0, %c0_i32 : i32, i32
  }
  func.func @transform_2(%arg0: i32) -> (i32, i32) {
    %c0_i32 = arith.constant 0 : i32
    %c0_i32_0 = arith.constant 0 : i32
    %c0_i32_1 = arith.constant 0 : i32
    return %c0_i32, %c0_i32_0 : i32, i32
  }
  func.func @transform_3(%arg0: i32) -> (i32, i32) {
    %c0_i32 = arith.constant 0 : i32
    %c0_i32_0 = arith.constant 0 : i32
    %c0_i32_1 = arith.constant 0 : i32
    return %c0_i32, %c0_i32_0 : i32, i32
  }
  func.func @transform_4(%arg0: i32) -> (i32, i32) {
    %c0_i32 = arith.constant 0 : i32
    %c0_i32_0 = arith.constant 0 : i32
    %c0_i32_1 = arith.constant 0 : i32
    return %c0_i32, %c0_i32_0 : i32, i32
  }
  func.func @transform_5(%arg0: i32) -> (i32, i32) {
    %c0_i32 = arith.constant 0 : i32
    %c0_i32_0 = arith.constant 0 : i32
    %c0_i32_1 = arith.constant 0 : i32
    return %c0_i32, %c0_i32_0 : i32, i32
  }
  func.func @transform_6(%arg0: i32) -> (i32, i32) {
    %c0_i32 = arith.constant 0 : i32
    %c0_i32_0 = arith.constant 0 : i32
    %c0_i32_1 = arith.constant 0 : i32
    return %c0_i32, %c0_i32_0 : i32, i32
  }
  func.func @transform_7(%arg0: i32) -> (i32, i32) {
    %c0_i32 = arith.constant 0 : i32
    %c0_i32_0 = arith.constant 0 : i32
    %c0_i32_1 = arith.constant 0 : i32
    return %c0_i32, %c0_i32_0 : i32, i32
  }
  func.func @transform_8(%arg0: i32) -> (i32, i32) {
    %c0_i32 = arith.constant 0 : i32
    %c0_i32_0 = arith.constant 0 : i32
    %c0_i32_1 = arith.constant 0 : i32
    return %c0_i32, %c0_i32_0 : i32, i32
  }
  func.func @transform_9(%arg0: i32) -> (i32, i32) {
    %c0_i32 = arith.constant 0 : i32
    %c0_i32_0 = arith.constant 0 : i32
    return %arg0, %c0_i32 : i32, i32
  }
}

</mosaic_0001>

<bundles_post_ra>
// kernel: tpu_custom_call.1
= control target key start
LH: loop header
LB: loop body
LE: loop exit
PB: predicated region body
PF: predicated region fallthrough
CT: control target
= control target key end

     0   :  { %s531_s0 = inlined_call_operand.vmem [shape: f32[8,4], index: 0, kind: input, shape index: {}]   ;;  %s532_s1 = inlined_call_operand.vmem [shape: f32[8,4], index: 1, kind: input, shape index: {}]   ;;  %s533_s2 = inlined_call_operand.vmem [shape: f32[4,128], index: 2, kind: input, shape index: {}]   ;;  %s534_s3 = inlined_call_operand.vmem [shape: f32[4,128], index: 3, kind: input, shape index: {}]   ;;  %s535_s4 = inlined_call_operand.vmem [shape: f32[1,128], index: 4, kind: input, shape index: {}]   ;;  %s536_s5 = inlined_call_operand.hbm [shape: f32[128,128], index: 5, kind: input, shape index: {}]   ;;  %s537_s6 = inlined_call_operand.vmem [shape: f32[1,128], index: 6, kind: input, shape index: {}]   ;;  %s538_s7 = inlined_call_operand.vmem [shape: f32[1,128], index: 7, kind: input, shape index: {}]   ;;  %s539_s8 = inlined_call_operand.<no memory space> [shape: f32[1,1], index: 8, kind: input, shape index: {}]   ;;  %s540_s9 = inlined_call_operand.vmem [shape: f32[8,1], index: 9, kind: output, shape index: {}]  }
   0x1   :  { %v14_v0 = vstv %s539_s8 }
   0x2   :  { %15 = vst [vmem:[#allocation2] sm:$0x1] %v14_v0 }
   0x3   :  { %16 = vsyncpa [#allocation4], 0  ;;  %s446_s11 = smov [#allocation3]  }
   0x4   :  { %s32_s12 = sshll.u32 %s446_s11, 4  ;;  %s33_s12 = int_to_ptr.vmem [resolvable:$true] %s32_s12 }
   0x5   :  { %s432_s13 = scalar_lea.vmem %s33_s12, 2048  ;;  %p437_p1 = scmp.lt.s32.totalorder %s33_s12, %s33_s12 }
   0x6   :  { %p433_p0 = scmp.ne.s32.totalorder %s33_s12, %s432_s13  ;;  %p438_p2 = scmp.lt.s32.totalorder %s432_s13, %s432_s13 }
   0x8   :  { %p439_p3 = por %p438_p2, %p437_p1 }
   0xa   :  { %p440_p4 = pnand %p439_p3, %p433_p0 }
   0xc   :  { %443 = shalt.err (!%p440_p4)
}
   0xd   :  { %s447_s14 = smov 128   ;;  %s448_s15 = smov 8  }
   0xe   :  { %38 = dma.hbm_to_vmem [thread:$0]  %s536_s5, 2048, %s33_s12, [#allocation4], %s447_s14, %s447_s14, %s448_s15  }
   0xf   :  { %444 = dma.done.wait [#allocation4], 2048  }
  0x10   :  { %445 = vsyncadd [#allocation4], 4294965248  ;;  %v449_v1 = vmov 0.0   ;;  %vm450_vm0 = vmmov 0   ;;  %vm57_vm1 = vcmask 1043456   ;;  %vm53_vm2 = vcmask 31744  }
  0x11   :  { %372 = vmatprep.subr.mxu1 %v449_v1  ;;  %374 = vmatprep.mubr.msk.f32.mxu1 %vm450_vm0, %v449_v1  ;;  %v49_v2 = vld [vmem:[%s534_s3] sm:$0xf]  ;;  %v229_v7 = vld [vmem:[#allocation3 + $0x70] sm:$0xff]  ;;  %v228_v8 = vld [vmem:[#allocation3 + $0x68] sm:$0xff]  ;;  %v330_v41 = vlaneseq  ;;  %vm336_vm4 = vcmask 7168  }
  0x12   :  { %382 = vmatprep.subr.mxu0 %v449_v1  ;;  %414 = vmatprep.mubr.msk.f32.mxu0 %vm450_vm0, %v449_v1  ;;  %v52_v3 = vld [vmem:[%s532_s1] sm:$0xff]  ;;  %v225_v11 = vld [vmem:[#allocation3 + $0x50] sm:$0xff]  ;;  %v224_v12 = vld [vmem:[#allocation3 + $0x48] sm:$0xff] }
  0x13   :  { %v48_v4 = vld [vmem:[%s533_s2] sm:$0xf]  ;;  %373 = vmatpush3.msk.msra.mxu1 %vm57_vm1, %v49_v2  ;;  %v221_v15 = vld [vmem:[#allocation3 + $0x30] sm:$0xff]  ;;  %v220_v16 = vld [vmem:[#allocation3 + $0x28] sm:$0xff]  ;;  %v331_v42 = vshrl.u32 %v330_v41, 7 }
  0x14   :  { %v230_v5 = vld [vmem:[#allocation3 + $0x78] sm:$0xff]  ;;  %375 = vmatmul.mubr.msk.f32.vlgmr.msra.gmra.mxu1 %vm53_vm2, %v52_v3  ;;  %377 = vmatprep.subr.mxu1 %v449_v1  ;;  %v227_v9 = vld [vmem:[#allocation3 + $0x60] sm:$0xff]  ;;  %v217_v19 = vld [vmem:[#allocation3 + $0x10] sm:$0xff] }
  0x15   :  { %378 = vmatpush3.msk.msra.mxu1 %vm57_vm1, %v48_v4  ;;  %379 = vmatprep.mubr.msk.f32.mxu1 %vm450_vm0, %v449_v1  ;;  %v51_v6 = vld [vmem:[%s531_s0] sm:$0xff]  ;;  %v216_v20 = vld [vmem:[#allocation3 + $0x8] sm:$0xff]  ;;  %vm334_vm3 = vcmp.lt.s32.totalorder %v331_v42, 2 }
  0x16   :  { %383 = vmatpush3.msra.mxu0 %v230_v5  ;;  %v226_v10 = vld [vmem:[#allocation3 + $0x58] sm:$0xff]  ;;  %v223_v13 = vld [vmem:[#allocation3 + $0x40] sm:$0xff] }
  0x17   :  { %384 = vmatprep.subr.mxu0 %v449_v1  ;;  %v222_v14 = vld [vmem:[#allocation3 + $0x38] sm:$0xff]  ;;  %v219_v17 = vld [vmem:[#allocation3 + $0x20] sm:$0xff] }
  0x18   :  { %380 = vmatmul.mubr.msk.f32.vlgmr.msra.gmra.mxu1 %vm53_vm2, %v51_v6  ;;  %385 = vmatpush3.msra.mxu0 %v229_v7  ;;  %v218_v18 = vld [vmem:[#allocation3 + $0x18] sm:$0xff]  ;;  %v215_v21 = vld [vmem:[#allocation3] sm:$0xff] }
  0x19   :  { %386 = vmatprep.subr.mxu0 %v449_v1  ;;  %v347_v24 = vld [vmem:[%s535_s4] ss:$0 sm:$0xff] }
  0x1a   :  { %387 = vmatpush3.msra.mxu0 %v228_v8  ;;  %v348_v30 = vld [vmem:[%s537_s6] ss:$0 sm:$0xff] }
  0x1b   :  { %388 = vmatprep.subr.mxu0 %v449_v1  ;;  %v349_v34 = vld [vmem:[%s538_s7] ss:$0 sm:$0xff] }
  0x1c   :  { %389 = vmatpush3.msra.mxu0 %v227_v9  ;;  %v350_v37 = vld [vmem:[#allocation2] ss:$0 sm:$0xff] }
  0x1d   :  { %390 = vmatprep.subr.mxu0 %v449_v1 }
  0x1e   :  { %391 = vmatpush3.msra.mxu0 %v226_v10 }
  0x1f   :  { %392 = vmatprep.subr.mxu0 %v449_v1 }
  0x20   :  { %393 = vmatpush3.msra.mxu0 %v225_v11 }
  0x21   :  { %394 = vmatprep.subr.mxu0 %v449_v1 }
  0x22   :  { %395 = vmatpush3.msra.mxu0 %v224_v12 }
  0x23   :  { %396 = vmatprep.subr.mxu0 %v449_v1 }
  0x24   :  { %397 = vmatpush3.msra.mxu0 %v223_v13 }
  0x25   :  { %398 = vmatprep.subr.mxu0 %v449_v1 }
  0x26   :  { %399 = vmatpush3.msra.mxu0 %v222_v14 }
  0x27   :  { %400 = vmatprep.subr.mxu0 %v449_v1 }
  0x28   :  { %401 = vmatpush3.msra.mxu0 %v221_v15 }
  0x29   :  { %402 = vmatprep.subr.mxu0 %v449_v1 }
  0x2a   :  { %403 = vmatpush3.msra.mxu0 %v220_v16 }
  0x2b   :  { %404 = vmatprep.subr.mxu0 %v449_v1 }
  0x2c   :  { %405 = vmatpush3.msra.mxu0 %v219_v17 }
  0x2d   :  { %406 = vmatprep.subr.mxu0 %v449_v1 }
  0x2e   :  { %407 = vmatpush3.msra.mxu0 %v218_v18 }
  0x2f   :  { %408 = vmatprep.subr.mxu0 %v449_v1 }
  0x30   :  { %409 = vmatpush3.msra.mxu0 %v217_v19 }
  0x31   :  { %410 = vmatprep.subr.mxu0 %v449_v1 }
  0x32   :  { %411 = vmatpush3.msra.mxu0 %v216_v20 }
  0x33   :  { %412 = vmatprep.subr.mxu0 %v449_v1 }
  0x34   :  { %413 = vmatpush3.msra.mxu0 %v215_v21 }
  0xd4   :  { %v127_v22 = vpop.f32.mrf.mxu1 }
  0xd6   :  { %v376_v23 = vpop.f32.mrf.mxu1 }
  0xd8   :  { %v203_v25 = vpop.f32.mrf.mxu1 }
  0xd9   :  { %v204_v26 = vadd.f32 %v203_v25, %v127_v22 }
  0xda   :  { %v381_v27 = vpop.f32.mrf.mxu1 }
  0xdb   :  { %v213_v28 = vadd.f32 %v347_v24, %v204_v26 }
  0xdd   :  { %v214_v29 = vmax.f32 %v213_v28, 0.0 }
  0xdf   :  { %415 = vmatmul.mubr.f32.vlgmr.msra.gmra.mxu0 %v214_v29 }
 0x19f   :  { %v304_v31 = vpop.f32.mrf.mxu0 }
 0x1a0   :  { %v305_v32 = vadd.f32 %v348_v30, %v304_v31 }
 0x1a1   :  { %v416_v33 = vpop.f32.mrf.mxu0 }
 0x1a2   :  { %v308_v35 = vmax.f32 %v305_v32, 0.0 }
 0x1a4   :  { %v317_v36 = vmul.f32 %v349_v34, %v308_v35 }
 0x1a6   :  { %318 = vadd.xlane.f32.xlu0 %v317_v36 }
 0x22f   :  { %v319_v38 = vpop.xlane.xlu0 %318 }
 0x230   :  { %v326_v39 = vadd.f32 %v350_v37, %v319_v38 }
 0x232   :  { %v327_v40 = vmul.f32 1.442695, %v326_v39 }
 0x234   :  { %422 = vpow2.f32 %v327_v40 }
 0x241   :  { %v423_v43 = vpop.eup %422 }
 0x242   :  { %v335_v44 = vsel %vm334_vm3, %v423_v43, 0.0 }
 0x243   :  { %337 = vst.msk [vmem:[%s540_s9] sm:$0xff] %vm336_vm4, %v335_v44 }
 0x244   :  { %342 = vsyncpa [#allocation4], 1 }

</bundles_post_ra>
